<compile_context>
chip_gen: v6e
topology: v6e:2x2x1
jax: 0.10.0
libtpu: 0.0.40
codegen_flags: <defaults>
</compile_context>

<pallas_src>
import functools

import jax
import jax.numpy as jnp
from jax import lax
from jax.experimental import pallas as pl
from jax.experimental.pallas import tpu as pltpu


def _mha_kernel(q_ref, kv_ref,
                wq_ref, wkv_ref, wo_ref,
                bq_ref, bkv_ref, bo_ref,
                o_ref, *, num_heads, head_dim):
    Bt, Lq, D = q_ref.shape
    Lkv = kv_ref.shape[1]
    H, hd = num_heads, head_dim

    # Flatten rows for MXU-friendly projections. Leading-dim collapse keeps the
    # lane (D) axis intact -> no relayout for Lq/Lkv multiples of 8.
    q2 = q_ref[...].reshape(Bt * Lq, D)        # bf16 (cast in wrapper)
    kv2 = kv_ref[...].reshape(Bt * Lkv, D)     # bf16

    # --- input projections (bf16 operands, f32 accumulation) ---
    Q = jnp.dot(q2, wq_ref[...], preferred_element_type=jnp.float32) + bq_ref[0]
    # Fused K/V projection: one matmul, 2*D-lane-wide output.
    KV = jnp.dot(kv2, wkv_ref[...], preferred_element_type=jnp.float32) + bkv_ref[0]
    K = KV[:, :D]
    V = KV[:, D:]

    scale = 1.0 / jnp.sqrt(jnp.float32(hd))
    Q3 = (Q * scale).reshape(Bt, Lq, D)        # f32
    K3 = K.reshape(Bt, Lkv, D)                 # f32
    V3 = V.reshape(Bt, Lkv, D)                 # f32

    # dot_general dimension numbers: batch over the batch-tile dim.
    dn_scores = (((2,), (2,)), ((0,), (0,)))   # contract head_dim
    dn_ctx = (((2,), (1,)), ((0,), (0,)))      # contract Lkv

    # Static head loop with static lane slices (avoids (L, H, hd) reshapes and
    # per-head XLU transposes from batched einsums).
    ctx_heads = []
    for h in range(H):
        sl = slice(h * hd, (h + 1) * hd)
        Qh = Q3[:, :, sl].astype(jnp.bfloat16)     # (Bt, Lq, hd)
        Kh = K3[:, :, sl].astype(jnp.bfloat16)     # (Bt, Lkv, hd)
        Vh = V3[:, :, sl].astype(jnp.bfloat16)     # (Bt, Lkv, hd)

        s = lax.dot_general(Qh, Kh, dn_scores,
                            preferred_element_type=jnp.float32)   # (Bt, Lq, Lkv) f32

        # max-stabilized softmax in f32
        m = jnp.max(s, axis=-1, keepdims=True)
        p = jnp.exp(s - m)
        denom = jnp.sum(p, axis=-1, keepdims=True)
        attn = p * pl.reciprocal(denom, approx=True)

        ctx_h = lax.dot_general(attn.astype(jnp.bfloat16), Vh, dn_ctx,
                                preferred_element_type=jnp.float32)  # (Bt, Lq, hd)
        ctx_heads.append(ctx_h)

    ctx = jnp.concatenate(ctx_heads, axis=-1)      # (Bt, Lq, D) f32

    # --- output projection ---
    ctx2 = ctx.reshape(Bt * Lq, D).astype(jnp.bfloat16)
    out = jnp.dot(ctx2, wo_ref[...], preferred_element_type=jnp.float32) + bo_ref[0]
    o_ref[...] = out.reshape(Bt, Lq, D).astype(o_ref.dtype)


def _pick_batch_tile(B, Lq, Lkv, D, target_rows=256, vmem_budget=8 * 1024 * 1024):
    """Smallest divisor of B whose row count reaches target_rows (VMEM-capped)."""
    per_batch_bytes = 4 * (2 * Lq * D + 3 * Lkv * D + Lq * Lkv + Lq * D)
    max_bt = max(1, vmem_budget // max(per_batch_bytes, 1))
    best = 1
    for bt in range(1, B + 1):
        if B % bt != 0 or bt > max_bt:
            continue
        best = bt
        if bt * Lq >= target_rows:
            break
    return best


def multihead_cross_attention(q, kv, params, num_heads, compute_dtype=jnp.bfloat16):
    """q: (B, Lq, D), kv: (B, Lkv, D). Returns (B, Lq, D) in q.dtype."""
    B, Lq, D = q.shape
    Lkv = kv.shape[1]
    wq_t, wkv_t, wo_t, bq, bkv, bo = params

    Bt = _pick_batch_tile(B, Lq, Lkv, D)
    grid = (B // Bt,)

    # bf16 matmul operands: activations + weights; biases stay f32.
    q_c = q.astype(compute_dtype)
    kv_c = kv.astype(compute_dtype)
    wq_c = wq_t.astype(compute_dtype)
    wkv_c = wkv_t.astype(compute_dtype)
    wo_c = wo_t.astype(compute_dtype)
    bq_f = bq.astype(jnp.float32)
    bkv_f = bkv.astype(jnp.float32)
    bo_f = bo.astype(jnp.float32)

    kernel = functools.partial(_mha_kernel, num_heads=num_heads,
                               head_dim=D // num_heads)
    full2d = lambda b: (0, 0)

    # NOTE: at production D, consider pipeline_mode=pl.Buffered(1) on the
    # constant-index weight specs to avoid double-buffering resident weights.
    return pl.pallas_call(
        kernel,
        out_shape=jax.ShapeDtypeStruct((B, Lq, D), q.dtype),
        grid_spec=pltpu.PrefetchScalarGridSpec(
            num_scalar_prefetch=0,
            grid=grid,
            in_specs=[
                pl.BlockSpec((Bt, Lq, D), lambda b: (b, 0, 0)),
                pl.BlockSpec((Bt, Lkv, D), lambda b: (b, 0, 0)),
                pl.BlockSpec((D, D), full2d),
                pl.BlockSpec((D, 2 * D), full2d),
                pl.BlockSpec((D, D), full2d),
                pl.BlockSpec((1, D), full2d),
                pl.BlockSpec((1, 2 * D), full2d),
                pl.BlockSpec((1, D), full2d),
            ],
            out_specs=pl.BlockSpec((Bt, Lq, D), lambda b: (b, 0, 0)),
        ),
        compiler_params=pltpu.CompilerParams(
            dimension_semantics=("parallel",),
            vmem_limit_bytes=64 * 1024 * 1024,
        ),
    )(q_c, kv_c, wq_c, wkv_c, wo_c, bq_f, bkv_f, bo_f)


def make_params(key, d_model):
    """Deterministic init matching nn.MultiheadAttention parameter shapes.

    in_proj_weight: (3*D, D), in_proj_bias: (3*D,)
    out_proj.weight: (D, D),  out_proj.bias: (D,)
    Weights are pre-transposed (x @ W.T == x @ W_t) and K/V are fused into one
    (D, 2D) matrix / (1, 2D) bias so the kernel does a single KV projection.
    """
    k1, k2, k3, k4 = jax.random.split(key, 4)
    D = d_model
    scale = 1.0 / jnp.sqrt(jnp.float32(D))
    in_proj_w = jax.random.uniform(k1, (3 * D, D), jnp.float32, -scale, scale)
    in_proj_b = jax.random.uniform(k2, (3 * D,), jnp.float32, -scale, scale)
    out_w = jax.random.uniform(k3, (D, D), jnp.float32, -scale, scale)
    out_b = jax.random.uniform(k4, (D,), jnp.float32, -scale, scale)

    wq, wk, wv = in_proj_w[:D], in_proj_w[D:2 * D], in_proj_w[2 * D:]
    bq, bk, bv = in_proj_b[:D], in_proj_b[D:2 * D], in_proj_b[2 * D:]

    wq_t = wq.T                                        # (D, D)
    wkv_t = jnp.concatenate([wk.T, wv.T], axis=1)      # (D, 2D)
    wo_t = out_w.T                                     # (D, D)
    bkv = jnp.concatenate([bk, bv]).reshape(1, 2 * D)  # (1, 2D)

    return (wq_t, wkv_t, wo_t,
            bq.reshape(1, D), bkv, out_b.reshape(1, D))


def _reference(q, kv, params, num_heads):
    """Pure-JAX f32 reference matching nn.MultiheadAttention forward."""
    wq_t, wkv_t, wo_t, bq, bkv, bo = params
    B, Lq, D = q.shape
    Lkv = kv.shape[1]
    H, hd = num_heads, D // num_heads
    Q = q @ wq_t + bq[0]
    KV = kv @ wkv_t + bkv[0]
    K, V = KV[..., :D], KV[..., D:]
    Qh = Q.reshape(B, Lq, H, hd)
    Kh = K.reshape(B, Lkv, H, hd)
    Vh = V.reshape(B, Lkv, H, hd)
    s = jnp.einsum('bqhd,bkhd->bhqk', Qh, Kh) / jnp.sqrt(jnp.float32(hd))
    a = jax.nn.softmax(s, axis=-1)
    ctx = jnp.einsum('bhqk,bkhd->bqhd', a, Vh).reshape(B, Lq, D)
    return ctx @ wo_t + bo[0]


if __name__ == "__main__":
    # Small shapes consistent with the module (d_model divisible by num_heads).
    B, Lq, Lkv = 2, 8, 16
    d_model, num_heads = 128, 4

    key = jax.random.PRNGKey(0)
    kq, kkv, kp = jax.random.split(key, 3)
    q_tensors = jax.random.normal(kq, (B, Lq, d_model), jnp.float32)
    kv_tensors = jax.random.normal(kkv, (B, Lkv, d_model), jnp.float32)
    params = make_params(kp, d_model)

    out = multihead_cross_attention(q_tensors, kv_tensors, params, num_heads)
    out = jax.block_until_ready(out)

    ref = _reference(q_tensors, kv_tensors, params, num_heads)
    assert out.shape == (B, Lq, d_model)
    # bf16 MXU operands with f32 accumulation vs an f32 reference -> loosened tolerance.
    assert jnp.allclose(out, ref, atol=3e-2, rtol=3e-2), "mismatch vs reference"

    print("KERNEL_OK")
</pallas_src>

<mosaic_0001>
module attributes {stable_mosaic.version = 11 : i64} {
  func.func @_mha_kernel(%arg0: i32, %arg1: memref<2x8x128xbf16, #tpu.memory_space<vmem>>, %arg2: memref<2x16x128xbf16, #tpu.memory_space<vmem>>, %arg3: memref<128x128xbf16, #tpu.memory_space<vmem>>, %arg4: memref<128x256xbf16, #tpu.memory_space<vmem>>, %arg5: memref<128x128xbf16, #tpu.memory_space<vmem>>, %arg6: memref<1x128xf32, #tpu.memory_space<vmem>>, %arg7: memref<1x256xf32, #tpu.memory_space<vmem>>, %arg8: memref<1x128xf32, #tpu.memory_space<vmem>>, %arg9: memref<2x8x128xf32, #tpu.memory_space<vmem>>) attributes {dimension_semantics = [#tpu.dimension_semantics<parallel>], iteration_bounds = array<i64: 1>, scalar_prefetch = 0 : i64, scratch_operands = 0 : i64, tpu.core_type = #tpu.core_type<tc>, window_params = [{transform_indices = @transform_0, window_bounds = array<i64: 2, 8, 128>}, {transform_indices = @transform_1, window_bounds = array<i64: 2, 16, 128>}, {pipeline_mode = #tpu.pipeline_mode<synchronous>, transform_indices = @transform_2, window_bounds = array<i64: 128, 128>}, {pipeline_mode = #tpu.pipeline_mode<synchronous>, transform_indices = @transform_3, window_bounds = array<i64: 128, 256>}, {pipeline_mode = #tpu.pipeline_mode<synchronous>, transform_indices = @transform_4, window_bounds = array<i64: 128, 128>}, {pipeline_mode = #tpu.pipeline_mode<synchronous>, transform_indices = @transform_5, window_bounds = array<i64: 1, 128>}, {pipeline_mode = #tpu.pipeline_mode<synchronous>, transform_indices = @transform_6, window_bounds = array<i64: 1, 256>}, {pipeline_mode = #tpu.pipeline_mode<synchronous>, transform_indices = @transform_7, window_bounds = array<i64: 1, 128>}, {transform_indices = @transform_8, window_bounds = array<i64: 2, 8, 128>}]} {
    %c0 = arith.constant 0 : index
    %c0_0 = arith.constant 0 : index
    %c0_1 = arith.constant 0 : index
    %0 = vector.load %arg1[%c0, %c0_0, %c0_1] : memref<2x8x128xbf16, #tpu.memory_space<vmem>>, vector<2x8x128xbf16>
    %1 = vector.shape_cast %0 : vector<2x8x128xbf16> to vector<16x128xbf16>
    %c0_2 = arith.constant 0 : index
    %c0_3 = arith.constant 0 : index
    %c0_4 = arith.constant 0 : index
    %2 = vector.load %arg2[%c0_2, %c0_3, %c0_4] : memref<2x16x128xbf16, #tpu.memory_space<vmem>>, vector<2x16x128xbf16>
    %3 = vector.shape_cast %2 : vector<2x16x128xbf16> to vector<32x128xbf16>
    %c0_5 = arith.constant 0 : index
    %c0_6 = arith.constant 0 : index
    %4 = vector.load %arg3[%c0_5, %c0_6] : memref<128x128xbf16, #tpu.memory_space<vmem>>, vector<128x128xbf16>
    %cst = arith.constant dense<0.000000e+00> : vector<16x128xf32>
    %5 = tpu.matmul %1, %4, %cst {dimension_numbers = #tpu.dot_dimension_numbers<[1], [0], [0], [1], [0, 0, 1, 1], [], []>} : vector<16x128xbf16>, vector<128x128xbf16>, vector<16x128xf32> -> vector<16x128xf32>
    %c0_7 = arith.constant 0 : index
    %c0_8 = arith.constant 0 : index
    %6 = vector.load %arg6[%c0_7, %c0_8] : memref<1x128xf32, #tpu.memory_space<vmem>>, vector<1x128xf32>
    %7 = vector.shape_cast %6 : vector<1x128xf32> to vector<128xf32>
    %8 = vector.shape_cast %7 : vector<128xf32> to vector<1x128xf32>
    %9 = vector.broadcast %8 : vector<1x128xf32> to vector<16x128xf32>
    %10 = arith.addf %5, %9 : vector<16x128xf32>
    %c0_9 = arith.constant 0 : index
    %c0_10 = arith.constant 0 : index
    %11 = vector.load %arg4[%c0_9, %c0_10] : memref<128x256xbf16, #tpu.memory_space<vmem>>, vector<128x256xbf16>
    %cst_11 = arith.constant dense<0.000000e+00> : vector<32x256xf32>
    %12 = tpu.matmul %3, %11, %cst_11 {dimension_numbers = #tpu.dot_dimension_numbers<[1], [0], [0], [1], [0, 0, 1, 1], [], []>} : vector<32x128xbf16>, vector<128x256xbf16>, vector<32x256xf32> -> vector<32x256xf32>
    %c0_12 = arith.constant 0 : index
    %c0_13 = arith.constant 0 : index
    %13 = vector.load %arg7[%c0_12, %c0_13] : memref<1x256xf32, #tpu.memory_space<vmem>>, vector<1x256xf32>
    %14 = vector.shape_cast %13 : vector<1x256xf32> to vector<256xf32>
    %15 = vector.shape_cast %14 : vector<256xf32> to vector<1x256xf32>
    %16 = vector.broadcast %15 : vector<1x256xf32> to vector<32x256xf32>
    %17 = arith.addf %12, %16 : vector<32x256xf32>
    %18 = vector.extract_strided_slice %17 {offsets = [0, 0], sizes = [32, 128], strides = [1, 1]} : vector<32x256xf32> to vector<32x128xf32>
    %19 = vector.extract_strided_slice %17 {offsets = [0, 128], sizes = [32, 128], strides = [1, 1]} : vector<32x256xf32> to vector<32x128xf32>
    %cst_14 = arith.constant 3.200000e+01 : f32
    %20 = math.sqrt %cst_14 : f32
    %cst_15 = arith.constant 1.000000e+00 : f32
    %21 = arith.divf %cst_15, %20 : f32
    %22 = vector.broadcast %21 : f32 to vector<16x128xf32>
    %23 = arith.mulf %10, %22 : vector<16x128xf32>
    %24 = vector.shape_cast %23 : vector<16x128xf32> to vector<2x8x128xf32>
    %25 = vector.shape_cast %18 : vector<32x128xf32> to vector<2x16x128xf32>
    %26 = vector.shape_cast %19 : vector<32x128xf32> to vector<2x16x128xf32>
    %27 = vector.extract_strided_slice %24 {offsets = [0, 0, 0], sizes = [2, 8, 32], strides = [1, 1, 1]} : vector<2x8x128xf32> to vector<2x8x32xf32>
    %28 = arith.truncf %27 : vector<2x8x32xf32> to vector<2x8x32xbf16>
    %29 = vector.extract_strided_slice %25 {offsets = [0, 0, 0], sizes = [2, 16, 32], strides = [1, 1, 1]} : vector<2x16x128xf32> to vector<2x16x32xf32>
    %30 = arith.truncf %29 : vector<2x16x32xf32> to vector<2x16x32xbf16>
    %31 = vector.extract_strided_slice %26 {offsets = [0, 0, 0], sizes = [2, 16, 32], strides = [1, 1, 1]} : vector<2x16x128xf32> to vector<2x16x32xf32>
    %32 = arith.truncf %31 : vector<2x16x32xf32> to vector<2x16x32xbf16>
    %cst_16 = arith.constant dense<0.000000e+00> : vector<2x8x16xf32>
    %33 = tpu.matmul %28, %30, %cst_16 {dimension_numbers = #tpu.dot_dimension_numbers<[2], [2], [1], [1], [0, 0, 0, 1, 1, 1], [0], [0]>} : vector<2x8x32xbf16>, vector<2x16x32xbf16>, vector<2x8x16xf32> -> vector<2x8x16xf32>
    %cst_17 = arith.constant dense<0xFF800000> : vector<2x8xf32>
    %34 = vector.multi_reduction <maximumf>, %33, %cst_17 [2] : vector<2x8x16xf32> to vector<2x8xf32>
    %35 = vector.shape_cast %34 : vector<2x8xf32> to vector<2x8x1xf32>
    %36 = vector.broadcast %35 : vector<2x8x1xf32> to vector<2x8x16xf32>
    %37 = arith.subf %33, %36 : vector<2x8x16xf32>
    %38 = math.exp %37 : vector<2x8x16xf32>
    %cst_18 = arith.constant dense<0.000000e+00> : vector<2x8xf32>
    %39 = vector.multi_reduction <add>, %38, %cst_18 [2] : vector<2x8x16xf32> to vector<2x8xf32>
    %40 = vector.shape_cast %39 : vector<2x8xf32> to vector<2x8x1xf32>
    %41 = tpu.reciprocal %40 {approx = true} : vector<2x8x1xf32> -> vector<2x8x1xf32>
    %42 = vector.broadcast %41 : vector<2x8x1xf32> to vector<2x8x16xf32>
    %43 = arith.mulf %38, %42 : vector<2x8x16xf32>
    %44 = arith.truncf %43 : vector<2x8x16xf32> to vector<2x8x16xbf16>
    %cst_19 = arith.constant dense<0.000000e+00> : vector<2x8x32xf32>
    %45 = tpu.matmul %44, %32, %cst_19 {dimension_numbers = #tpu.dot_dimension_numbers<[2], [1], [1], [2], [0, 0, 0, 1, 1, 2], [0], [0]>} : vector<2x8x16xbf16>, vector<2x16x32xbf16>, vector<2x8x32xf32> -> vector<2x8x32xf32>
    %46 = vector.extract_strided_slice %24 {offsets = [0, 0, 32], sizes = [2, 8, 32], strides = [1, 1, 1]} : vector<2x8x128xf32> to vector<2x8x32xf32>
    %47 = arith.truncf %46 : vector<2x8x32xf32> to vector<2x8x32xbf16>
    %48 = vector.extract_strided_slice %25 {offsets = [0, 0, 32], sizes = [2, 16, 32], strides = [1, 1, 1]} : vector<2x16x128xf32> to vector<2x16x32xf32>
    %49 = arith.truncf %48 : vector<2x16x32xf32> to vector<2x16x32xbf16>
    %50 = vector.extract_strided_slice %26 {offsets = [0, 0, 32], sizes = [2, 16, 32], strides = [1, 1, 1]} : vector<2x16x128xf32> to vector<2x16x32xf32>
    %51 = arith.truncf %50 : vector<2x16x32xf32> to vector<2x16x32xbf16>
    %cst_20 = arith.constant dense<0.000000e+00> : vector<2x8x16xf32>
    %52 = tpu.matmul %47, %49, %cst_20 {dimension_numbers = #tpu.dot_dimension_numbers<[2], [2], [1], [1], [0, 0, 0, 1, 1, 1], [0], [0]>} : vector<2x8x32xbf16>, vector<2x16x32xbf16>, vector<2x8x16xf32> -> vector<2x8x16xf32>
    %cst_21 = arith.constant dense<0xFF800000> : vector<2x8xf32>
    %53 = vector.multi_reduction <maximumf>, %52, %cst_21 [2] : vector<2x8x16xf32> to vector<2x8xf32>
    %54 = vector.shape_cast %53 : vector<2x8xf32> to vector<2x8x1xf32>
    %55 = vector.broadcast %54 : vector<2x8x1xf32> to vector<2x8x16xf32>
    %56 = arith.subf %52, %55 : vector<2x8x16xf32>
    %57 = math.exp %56 : vector<2x8x16xf32>
    %cst_22 = arith.constant dense<0.000000e+00> : vector<2x8xf32>
    %58 = vector.multi_reduction <add>, %57, %cst_22 [2] : vector<2x8x16xf32> to vector<2x8xf32>
    %59 = vector.shape_cast %58 : vector<2x8xf32> to vector<2x8x1xf32>
    %60 = tpu.reciprocal %59 {approx = true} : vector<2x8x1xf32> -> vector<2x8x1xf32>
    %61 = vector.broadcast %60 : vector<2x8x1xf32> to vector<2x8x16xf32>
    %62 = arith.mulf %57, %61 : vector<2x8x16xf32>
    %63 = arith.truncf %62 : vector<2x8x16xf32> to vector<2x8x16xbf16>
    %cst_23 = arith.constant dense<0.000000e+00> : vector<2x8x32xf32>
    %64 = tpu.matmul %63, %51, %cst_23 {dimension_numbers = #tpu.dot_dimension_numbers<[2], [1], [1], [2], [0, 0, 0, 1, 1, 2], [0], [0]>} : vector<2x8x16xbf16>, vector<2x16x32xbf16>, vector<2x8x32xf32> -> vector<2x8x32xf32>
    %65 = vector.extract_strided_slice %24 {offsets = [0, 0, 64], sizes = [2, 8, 32], strides = [1, 1, 1]} : vector<2x8x128xf32> to vector<2x8x32xf32>
    %66 = arith.truncf %65 : vector<2x8x32xf32> to vector<2x8x32xbf16>
    %67 = vector.extract_strided_slice %25 {offsets = [0, 0, 64], sizes = [2, 16, 32], strides = [1, 1, 1]} : vector<2x16x128xf32> to vector<2x16x32xf32>
    %68 = arith.truncf %67 : vector<2x16x32xf32> to vector<2x16x32xbf16>
    %69 = vector.extract_strided_slice %26 {offsets = [0, 0, 64], sizes = [2, 16, 32], strides = [1, 1, 1]} : vector<2x16x128xf32> to vector<2x16x32xf32>
    %70 = arith.truncf %69 : vector<2x16x32xf32> to vector<2x16x32xbf16>
    %cst_24 = arith.constant dense<0.000000e+00> : vector<2x8x16xf32>
    %71 = tpu.matmul %66, %68, %cst_24 {dimension_numbers = #tpu.dot_dimension_numbers<[2], [2], [1], [1], [0, 0, 0, 1, 1, 1], [0], [0]>} : vector<2x8x32xbf16>, vector<2x16x32xbf16>, vector<2x8x16xf32> -> vector<2x8x16xf32>
    %cst_25 = arith.constant dense<0xFF800000> : vector<2x8xf32>
    %72 = vector.multi_reduction <maximumf>, %71, %cst_25 [2] : vector<2x8x16xf32> to vector<2x8xf32>
    %73 = vector.shape_cast %72 : vector<2x8xf32> to vector<2x8x1xf32>
    %74 = vector.broadcast %73 : vector<2x8x1xf32> to vector<2x8x16xf32>
    %75 = arith.subf %71, %74 : vector<2x8x16xf32>
    %76 = math.exp %75 : vector<2x8x16xf32>
    %cst_26 = arith.constant dense<0.000000e+00> : vector<2x8xf32>
    %77 = vector.multi_reduction <add>, %76, %cst_26 [2] : vector<2x8x16xf32> to vector<2x8xf32>
    %78 = vector.shape_cast %77 : vector<2x8xf32> to vector<2x8x1xf32>
    %79 = tpu.reciprocal %78 {approx = true} : vector<2x8x1xf32> -> vector<2x8x1xf32>
    %80 = vector.broadcast %79 : vector<2x8x1xf32> to vector<2x8x16xf32>
    %81 = arith.mulf %76, %80 : vector<2x8x16xf32>
    %82 = arith.truncf %81 : vector<2x8x16xf32> to vector<2x8x16xbf16>
    %cst_27 = arith.constant dense<0.000000e+00> : vector<2x8x32xf32>
    %83 = tpu.matmul %82, %70, %cst_27 {dimension_numbers = #tpu.dot_dimension_numbers<[2], [1], [1], [2], [0, 0, 0, 1, 1, 2], [0], [0]>} : vector<2x8x16xbf16>, vector<2x16x32xbf16>, vector<2x8x32xf32> -> vector<2x8x32xf32>
    %84 = vector.extract_strided_slice %24 {offsets = [0, 0, 96], sizes = [2, 8, 32], strides = [1, 1, 1]} : vector<2x8x128xf32> to vector<2x8x32xf32>
    %85 = arith.truncf %84 : vector<2x8x32xf32> to vector<2x8x32xbf16>
    %86 = vector.extract_strided_slice %25 {offsets = [0, 0, 96], sizes = [2, 16, 32], strides = [1, 1, 1]} : vector<2x16x128xf32> to vector<2x16x32xf32>
    %87 = arith.truncf %86 : vector<2x16x32xf32> to vector<2x16x32xbf16>
    %88 = vector.extract_strided_slice %26 {offsets = [0, 0, 96], sizes = [2, 16, 32], strides = [1, 1, 1]} : vector<2x16x128xf32> to vector<2x16x32xf32>
    %89 = arith.truncf %88 : vector<2x16x32xf32> to vector<2x16x32xbf16>
    %cst_28 = arith.constant dense<0.000000e+00> : vector<2x8x16xf32>
    %90 = tpu.matmul %85, %87, %cst_28 {dimension_numbers = #tpu.dot_dimension_numbers<[2], [2], [1], [1], [0, 0, 0, 1, 1, 1], [0], [0]>} : vector<2x8x32xbf16>, vector<2x16x32xbf16>, vector<2x8x16xf32> -> vector<2x8x16xf32>
    %cst_29 = arith.constant dense<0xFF800000> : vector<2x8xf32>
    %91 = vector.multi_reduction <maximumf>, %90, %cst_29 [2] : vector<2x8x16xf32> to vector<2x8xf32>
    %92 = vector.shape_cast %91 : vector<2x8xf32> to vector<2x8x1xf32>
    %93 = vector.broadcast %92 : vector<2x8x1xf32> to vector<2x8x16xf32>
    %94 = arith.subf %90, %93 : vector<2x8x16xf32>
    %95 = math.exp %94 : vector<2x8x16xf32>
    %cst_30 = arith.constant dense<0.000000e+00> : vector<2x8xf32>
    %96 = vector.multi_reduction <add>, %95, %cst_30 [2] : vector<2x8x16xf32> to vector<2x8xf32>
    %97 = vector.shape_cast %96 : vector<2x8xf32> to vector<2x8x1xf32>
    %98 = tpu.reciprocal %97 {approx = true} : vector<2x8x1xf32> -> vector<2x8x1xf32>
    %99 = vector.broadcast %98 : vector<2x8x1xf32> to vector<2x8x16xf32>
    %100 = arith.mulf %95, %99 : vector<2x8x16xf32>
    %101 = arith.truncf %100 : vector<2x8x16xf32> to vector<2x8x16xbf16>
    %cst_31 = arith.constant dense<0.000000e+00> : vector<2x8x32xf32>
    %102 = tpu.matmul %101, %89, %cst_31 {dimension_numbers = #tpu.dot_dimension_numbers<[2], [1], [1], [2], [0, 0, 0, 1, 1, 2], [0], [0]>} : vector<2x8x16xbf16>, vector<2x16x32xbf16>, vector<2x8x32xf32> -> vector<2x8x32xf32>
    %103 = tpu.concatenate %45, %64, %83, %102 in 2 : vector<2x8x32xf32>, vector<2x8x32xf32>, vector<2x8x32xf32>, vector<2x8x32xf32> -> vector<2x8x128xf32>
    %104 = vector.shape_cast %103 : vector<2x8x128xf32> to vector<16x128xf32>
    %105 = arith.truncf %104 : vector<16x128xf32> to vector<16x128xbf16>
    %c0_32 = arith.constant 0 : index
    %c0_33 = arith.constant 0 : index
    %106 = vector.load %arg5[%c0_32, %c0_33] : memref<128x128xbf16, #tpu.memory_space<vmem>>, vector<128x128xbf16>
    %cst_34 = arith.constant dense<0.000000e+00> : vector<16x128xf32>
    %107 = tpu.matmul %105, %106, %cst_34 {dimension_numbers = #tpu.dot_dimension_numbers<[1], [0], [0], [1], [0, 0, 1, 1], [], []>} : vector<16x128xbf16>, vector<128x128xbf16>, vector<16x128xf32> -> vector<16x128xf32>
    %c0_35 = arith.constant 0 : index
    %c0_36 = arith.constant 0 : index
    %108 = vector.load %arg8[%c0_35, %c0_36] : memref<1x128xf32, #tpu.memory_space<vmem>>, vector<1x128xf32>
    %109 = vector.shape_cast %108 : vector<1x128xf32> to vector<128xf32>
    %110 = vector.shape_cast %109 : vector<128xf32> to vector<1x128xf32>
    %111 = vector.broadcast %110 : vector<1x128xf32> to vector<16x128xf32>
    %112 = arith.addf %107, %111 : vector<16x128xf32>
    %113 = vector.shape_cast %112 : vector<16x128xf32> to vector<2x8x128xf32>
    %c0_37 = arith.constant 0 : index
    %c0_38 = arith.constant 0 : index
    %c0_39 = arith.constant 0 : index
    %114 = vector.load %arg9[%c0_37, %c0_38, %c0_39] : memref<2x8x128xf32, #tpu.memory_space<vmem>>, vector<2x8x128xf32>
    tpu.vector_store %arg9[%c0_37, %c0_38, %c0_39], %113 {strides = array<i32>} : memref<2x8x128xf32, #tpu.memory_space<vmem>>, vector<2x8x128xf32>,
    return
  }
  func.func @transform_0(%arg0: i32) -> (i32, i32, i32) {
    %c0_i32 = arith.constant 0 : i32
    %c0_i32_0 = arith.constant 0 : i32
    %c0_i32_1 = arith.constant 0 : i32
    return %arg0, %c0_i32, %c0_i32_0 : i32, i32, i32
  }
  func.func @transform_1(%arg0: i32) -> (i32, i32, i32) {
    %c0_i32 = arith.constant 0 : i32
    %c0_i32_0 = arith.constant 0 : i32
    %c0_i32_1 = arith.constant 0 : i32
    return %arg0, %c0_i32, %c0_i32_0 : i32, i32, i32
  }
  func.func @transform_2(%arg0: i32) -> (i32, i32) {
    %c0_i32 = arith.constant 0 : i32
    %c0_i32_0 = arith.constant 0 : i32
    %c0_i32_1 = arith.constant 0 : i32
    return %c0_i32, %c0_i32_0 : i32, i32
  }
  func.func @transform_3(%arg0: i32) -> (i32, i32) {
    %c0_i32 = arith.constant 0 : i32
    %c0_i32_0 = arith.constant 0 : i32
    %c0_i32_1 = arith.constant 0 : i32
    return %c0_i32, %c0_i32_0 : i32, i32
  }
  func.func @transform_4(%arg0: i32) -> (i32, i32) {
    %c0_i32 = arith.constant 0 : i32
    %c0_i32_0 = arith.constant 0 : i32
    %c0_i32_1 = arith.constant 0 : i32
    return %c0_i32, %c0_i32_0 : i32, i32
  }
  func.func @transform_5(%arg0: i32) -> (i32, i32) {
    %c0_i32 = arith.constant 0 : i32
    %c0_i32_0 = arith.constant 0 : i32
    %c0_i32_1 = arith.constant 0 : i32
    return %c0_i32, %c0_i32_0 : i32, i32
  }
  func.func @transform_6(%arg0: i32) -> (i32, i32) {
    %c0_i32 = arith.constant 0 : i32
    %c0_i32_0 = arith.constant 0 : i32
    %c0_i32_1 = arith.constant 0 : i32
    return %c0_i32, %c0_i32_0 : i32, i32
  }
  func.func @transform_7(%arg0: i32) -> (i32, i32) {
    %c0_i32 = arith.constant 0 : i32
    %c0_i32_0 = arith.constant 0 : i32
    %c0_i32_1 = arith.constant 0 : i32
    return %c0_i32, %c0_i32_0 : i32, i32
  }
  func.func @transform_8(%arg0: i32) -> (i32, i32, i32) {
    %c0_i32 = arith.constant 0 : i32
    %c0_i32_0 = arith.constant 0 : i32
    %c0_i32_1 = arith.constant 0 : i32
    return %arg0, %c0_i32, %c0_i32_0 : i32, i32, i32
  }
}

</mosaic_0001>

<bundles_post_ra>
// kernel: tpu_custom_call.1
= control target key start
LH: loop header
LB: loop body
LE: loop exit
PB: predicated region body
PF: predicated region fallthrough
CT: control target
= control target key end

     0   :  { %13 = vsyncpa [#allocation3], 0  ;;  %s2189_s0 = inlined_call_operand.hbm [shape: bf16[2,8,128], index: 0, kind: input, shape index: {}]   ;;  %s2190_s1 = inlined_call_operand.hbm [shape: bf16[2,16,128], index: 1, kind: input, shape index: {}]   ;;  %s2191_s2 = inlined_call_operand.hbm [shape: bf16[128,128], index: 2, kind: input, shape index: {}]   ;;  %s2192_s3 = inlined_call_operand.hbm [shape: bf16[128,256], index: 3, kind: input, shape index: {}]   ;;  %s2193_s4 = inlined_call_operand.hbm [shape: bf16[128,128], index: 4, kind: input, shape index: {}]   ;;  %s2194_s5 = inlined_call_operand.vmem [shape: f32[1,128], index: 5, kind: input, shape index: {}]   ;;  %s2195_s6 = inlined_call_operand.vmem [shape: f32[1,256], index: 6, kind: input, shape index: {}]   ;;  %s2196_s7 = inlined_call_operand.vmem [shape: f32[1,128], index: 7, kind: input, shape index: {}]   ;;  %s2197_s8 = inlined_call_operand.hbm [shape: f32[2,8,128], index: 8, kind: output, shape index: {}]  }
   0x1   :  { %14 = vsyncpa [#allocation6], 0 }
   0x2   :  { %15 = vsyncpa [#allocation9], 0 }
   0x3   :  { %16 = vsyncpa [#allocation4], 0  ;;  %s1900_s27 = smov [#allocation5]   ;;  %s1901_s29 = smov [#allocation8]  }
   0x4   :  { %s34_s28 = sshll.u32 %s1900_s27, 4  ;;  %s58_s30 = sshll.u32 %s1901_s29, 4  ;;  %s35_s28 = int_to_ptr.vmem [resolvable:$true] %s34_s28  ;;  %s59_s30 = int_to_ptr.vmem [resolvable:$true] %s58_s30 }
   0x5   :  { %s1780_s9 = scalar_lea.vmem %s35_s28, 256  ;;  %p1785_p1 = scmp.lt.s32.totalorder %s35_s28, %s35_s28 }
   0x6   :  { %p1781_p0 = scmp.ne.s32.totalorder %s35_s28, %s1780_s9  ;;  %p1786_p2 = scmp.lt.s32.totalorder %s1780_s9, %s1780_s9 }
   0x8   :  { %p1787_p3 = por %p1786_p2, %p1785_p1 }
   0xa   :  { %p1788_p4 = pnand %p1787_p3, %p1781_p0 }
   0xc   :  { %1791 = shalt.err (!%p1788_p4)
}
   0xd   :  { %s1902_s10 = smov 64   ;;  %s1903_s11 = smov 4  }
   0xe   :  { %40 = dma.hbm_to_vmem [thread:$0]  %s2190_s1, 256, %s35_s28, [#allocation6], %s1902_s10, %s1902_s10, %s1903_s11  }
   0xf   :  { %s1800_s14 = scalar_lea.vmem %s59_s30, 2048  ;;  %p1805_p6 = scmp.lt.s32.totalorder %s59_s30, %s59_s30 }
  0x10   :  { %p1801_p5 = scmp.ne.s32.totalorder %s59_s30, %s1800_s14  ;;  %p1806_p7 = scmp.lt.s32.totalorder %s1800_s14, %s1800_s14 }
  0x12   :  { %p1807_p8 = por %p1806_p7, %p1805_p6 }
  0x14   :  { %p1808_p9 = pnand %p1807_p8, %p1801_p5 }
  0x16   :  { %1811 = shalt.err (!%p1808_p9)
}
  0x17   :  { %s1904_s15 = smov 128   ;;  %s1905_s16 = smov 8  }
  0x18   :  { %64 = dma.hbm_to_vmem [thread:$0]  %s2192_s3, 2048, %s59_s30, [#allocation9], %s1904_s15, %s1904_s15, %s1905_s16  }
  0x19   :  { %s1906_s19 = smov [#allocation2]   ;;  %s1907_s21 = smov [#allocation7]  }
  0x1a   :  { %s22_s20 = sshll.u32 %s1906_s19, 4  ;;  %s46_s1 = sshll.u32 %s1907_s21, 4  ;;  %s23_s20 = int_to_ptr.vmem [resolvable:$true] %s22_s20  ;;  %s47_s1 = int_to_ptr.vmem [resolvable:$true] %s46_s1 }
  0x1b   :  { %s1820_s22 = scalar_lea.vmem %s23_s20, 128  ;;  %p1825_p11 = scmp.lt.s32.totalorder %s23_s20, %s23_s20 }
  0x1c   :  { %p1821_p10 = scmp.ne.s32.totalorder %s23_s20, %s1820_s22  ;;  %p1826_p12 = scmp.lt.s32.totalorder %s1820_s22, %s1820_s22 }
  0x1e   :  { %p1827_p13 = por %p1826_p12, %p1825_p11 }
  0x20   :  { %p1828_p0 = pnand %p1827_p13, %p1821_p10 }
  0x22   :  { %1831 = shalt.err (!%p1828_p0)
}
  0x23   :  { %28 = dma.hbm_to_vmem [thread:$0]  %s2189_s0, 128, %s23_s20, [#allocation3], %s1902_s10, %s1902_s10, %s1903_s11  }
  0x24   :  { %s1840_s3 = scalar_lea.vmem %s47_s1, 1024  ;;  %p1845_p2 = scmp.lt.s32.totalorder %s47_s1, %s47_s1 }
  0x25   :  { %p1841_p1 = scmp.ne.s32.totalorder %s47_s1, %s1840_s3  ;;  %p1846_p3 = scmp.lt.s32.totalorder %s1840_s3, %s1840_s3 }
  0x27   :  { %p1847_p4 = por %p1846_p3, %p1845_p2 }
  0x29   :  { %p1848_p5 = pnand %p1847_p4, %p1841_p1 }
  0x2b   :  { %1851 = shalt.err (!%p1848_p5)
}
  0x2c   :  { %52 = dma.hbm_to_vmem [thread:$0]  %s2191_s2, 1024, %s47_s1, [#allocation6], %s1902_s10, %s1902_s10, %s1903_s11  }
  0x2d   :  { %s1908_s27 = smov [#allocation10]  }
  0x2e   :  { %s70_s28 = sshll.u32 %s1908_s27, 4  ;;  %s71_s28 = int_to_ptr.vmem [resolvable:$true] %s70_s28 }
  0x2f   :  { %s1860_s29 = scalar_lea.vmem %s71_s28, 1024  ;;  %p1865_p7 = scmp.lt.s32.totalorder %s71_s28, %s71_s28 }
  0x30   :  { %p1861_p6 = scmp.ne.s32.totalorder %s71_s28, %s1860_s29  ;;  %p1866_p8 = scmp.lt.s32.totalorder %s1860_s29, %s1860_s29 }
  0x32   :  { %p1867_p9 = por %p1866_p8, %p1865_p7 }
  0x34   :  { %p1868_p10 = pnand %p1867_p9, %p1861_p6 }
  0x36   :  { %1871 = shalt.err (!%p1868_p10)
}
  0x37   :  { %76 = dma.hbm_to_vmem [thread:$0]  %s2193_s4, 1024, %s71_s28, [#allocation9], %s1902_s10, %s1902_s10, %s1903_s11  }
  0x38   :  { %1892 = dma.done.wait [#allocation3], 128  }
  0x39   :  { %1893 = vsyncadd [#allocation3], 4294967168 }
  0x3a   :  { %1894 = dma.done.wait [#allocation6], 1280  }
  0x3b   :  { %1895 = vsyncadd [#allocation6], 4294966016 }
  0x3c   :  { %1896 = dma.done.wait [#allocation9], 3072  }
  0x3d   :  { %1897 = vsyncadd [#allocation9], 4294964224  ;;  %v1909_v0 = vmov 0.0   ;;  %v1910_v1 = vmov 0   ;;  %vm1911_vm0 = vmmov 0   ;;  %v1703_v6 = vld [vmem:[#allocation7 + $0x38] sm:$0xff]   ;;  %v241_v29 = vlaneseq }
  0x3e   :  { %1531 = vmatprep.subr.bf16.mxu0 %v1909_v0  ;;  %375 = vmatprep.mubr.bf16.mxu1 %v1910_v1  ;;  %v1697_v2 = vld [vmem:[#allocation8 + $0x74] ss:$8 sps:$4 sm:$0xff]   ;;  %v1699_v3 = vld [vmem:[#allocation8 + $0x70] ss:$8 sps:$4 sm:$0xff]   ;;  %v1700_v4 = vld [vmem:[#allocation8 + $0x64] ss:$8 sps:$4 sm:$0xff]  }
  0x3f   :  { %1547 = vmatprep.mubr.msk.bf16.mxu0 %vm1911_vm0, %v1909_v0  ;;  %343 = vmatprep.subr.bf16.mxu1 %v1697_v2  ;;  %v1702_v5 = vld [vmem:[#allocation8 + $0x60] ss:$8 sps:$4 sm:$0xff]   ;;  %v1704_v7 = vld [vmem:[#allocation8 + $0x54] ss:$8 sps:$4 sm:$0xff]   ;;  %v1706_v9 = vld [vmem:[#allocation8 + $0x50] ss:$8 sps:$4 sm:$0xff]  }
  0x40   :  { %344 = vmatpush1.bf16.msra.mxu1 %v1699_v3  ;;  %1532 = vmatpush3.bf16.msra.mxu0 %v1703_v6  ;;  %v1707_v8 = vld [vmem:[#allocation7 + $0x30] sm:$0xff]   ;;  %v1708_v10 = vld [vmem:[#allocation8 + $0x44] ss:$8 sps:$4 sm:$0xff]   ;;  %v1710_v12 = vld [vmem:[#allocation8 + $0x40] ss:$8 sps:$4 sm:$0xff]   ;;  %v242_v30 = vshrl.u32 %v241_v29, 7 }
  0x41   :  { %345 = vmatprep.subr.bf16.mxu1 %v1700_v4  ;;  %1533 = vmatprep.subr.bf16.mxu0 %v1909_v0  ;;  %v1711_v11 = vld [vmem:[#allocation7 + $0x28] sm:$0xff]   ;;  %v1712_v13 = vld [vmem:[#allocation8 + $0x34] ss:$8 sps:$4 sm:$0xff]   ;;  %v1715_v14 = vld [vmem:[#allocation7 + $0x20] sm:$0xff]   ;;  %vm404_vm1 = vcmask 261120   ;;  %vm497_vm2 = vcmask 130048  }
  0x42   :  { %v1714_v15 = vld [vmem:[#allocation8 + $0x30] ss:$8 sps:$4 sm:$0xff]   ;;  %v1716_v16 = vld [vmem:[#allocation8 + $0x24] ss:$8 sps:$4 sm:$0xff]   ;;  %v1718_v18 = vld [vmem:[#allocation8 + $0x20] ss:$8 sps:$4 sm:$0xff]  }
  0x43   :  { %v1719_v17 = vld [vmem:[#allocation7 + $0x18] sm:$0xff]   ;;  %v1723_v21 = vld [vmem:[#allocation7 + $0x10] sm:$0xff]   ;;  %v1724_v22 = vld [vmem:[#allocation8 + $0x4] ss:$8 sps:$4 sm:$0xff]   ;;  %v243_v31 = vsub.s32 0, %v242_v30  ;;  %v247_v41 = vsub.s32 1, %v242_v30 }
  0x44   :  { %346 = vmatpush1.bf16.msra.mxu1 %v1702_v5  ;;  %1534 = vmatpush3.bf16.msra.mxu0 %v1707_v8  ;;  %v1720_v19 = vld [vmem:[#allocation8 + $0x14] ss:$8 sps:$4 sm:$0xff]   ;;  %v1722_v20 = vld [vmem:[#allocation8 + $0x10] ss:$8 sps:$4 sm:$0xff]   ;;  %v1727_v23 = vld [vmem:[#allocation7 + $0x8] sm:$0xff]   ;;  %vm1288_vm3 = vcmask 523264  }
  0x45   :  { %347 = vmatprep.subr.bf16.mxu1 %v1704_v7  ;;  %1535 = vmatprep.subr.bf16.mxu0 %v1909_v0  ;;  %v1726_v24 = vld [vmem:[#allocation8] ss:$8 sps:$4 sm:$0xff]   ;;  %v1728_v26 = vld [vmem:[#allocation5] sm:$0xff]   ;;  %v1731_v28 = vld [vmem:[#allocation5 + $0x8] sm:$0xff]   ;;  %vm1291_vm4 = vcmask 785408   ;;  %s1914_s13 = smov [#allocation11]  }
  0x46   :  { %v1729_v25 = vld [vmem:[#allocation7] sm:$0xff]   ;;  %v1730_v27 = vld [vmem:[#allocation2] sm:$0xff]   ;;  %s1414_s14 = sshll.u32 %s1914_s13, 4  ;;  %s1415_s14 = int_to_ptr.vmem [resolvable:$true] %s1414_s14 }
  0x47   :  { %v239_v32 = vld [vmem:[%s2195_s6] sm:$0x3]  ;;  %s1913_s6 = smov 32   ;;  %s1872_s17 = scalar_lea.vmem %s1415_s14, 256 }
  0x48   :  { %348 = vmatpush1.bf16.msra.mxu1 %v1706_v9  ;;  %1536 = vmatpush3.bf16.msra.mxu0 %v1711_v11  ;;  %v244_v34 = vrot.slane %v239_v32, %v243_v31  ;;  %v1428_v36 = vld [vmem:[%s2194_s5] ss:$0 sm:$0xff]  ;;  %v248_v49 = vrot.slane %v239_v32, %v247_v41  ;;  %s1912_s5 = smov 96   ;;  %p1873_p11 = scmp.ne.s32.totalorder %s1415_s14, %s1872_s17 }
  0x49   :  { %349 = vmatprep.subr.bf16.mxu1 %v1708_v10  ;;  %1537 = vmatprep.subr.bf16.mxu0 %v1909_v0  ;;  %p1877_p12 = scmp.lt.s32.totalorder %s1415_s14, %s1415_s14  ;;  %p1878_p13 = scmp.lt.s32.totalorder %s1872_s17, %s1872_s17 }
  0x4b   :  { %p1879_p0 = por %p1878_p13, %p1877_p12 }
  0x4c   :  { %350 = vmatpush1.bf16.msra.mxu1 %v1710_v12  ;;  %1538 = vmatpush3.bf16.msra.mxu0 %v1715_v14 }
  0x4d   :  { %351 = vmatprep.subr.bf16.mxu1 %v1712_v13  ;;  %1539 = vmatprep.subr.bf16.mxu0 %v1909_v0  ;;  %p1880_p1 = pnand %p1879_p0, %p1873_p11 }
  0x50   :  { %352 = vmatpush1.bf16.msra.mxu1 %v1714_v15  ;;  %1540 = vmatpush3.bf16.msra.mxu0 %v1719_v17 }
  0x51   :  { %353 = vmatprep.subr.bf16.mxu1 %v1716_v16  ;;  %1541 = vmatprep.subr.bf16.mxu0 %v1909_v0 }
  0x54   :  { %354 = vmatpush1.bf16.msra.mxu1 %v1718_v18  ;;  %1542 = vmatpush3.bf16.msra.mxu0 %v1723_v21 }
  0x55   :  { %355 = vmatprep.subr.bf16.mxu1 %v1720_v19  ;;  %1543 = vmatprep.subr.bf16.mxu0 %v1909_v0 }
  0x58   :  { %356 = vmatpush1.bf16.msra.mxu1 %v1722_v20  ;;  %1544 = vmatpush3.bf16.msra.mxu0 %v1727_v23 }
  0x59   :  { %357 = vmatprep.subr.bf16.mxu1 %v1724_v22  ;;  %1545 = vmatprep.subr.bf16.mxu0 %v1909_v0 }
  0x5c   :  { %358 = vmatpush1.bf16.msra.mxu1 %v1726_v24  ;;  %1546 = vmatpush3.bf16.msra.mxu0 %v1729_v25 }
  0x5d   :  { %1575 = vmatprep.subr.bf16.mxu1 %v1909_v0  ;;  %1551 = vmatprep.subr.bf16.mxu0 %v1909_v0 }
  0x5f   :  { %376 = vmatmul.mubr.bf16.vlgmr.msra.gmra.mxu1 %v1728_v26  ;;  %1548 = vmatmul.mubr.bf16.vlgmr.msra.gmra.mxu0 %v1730_v27 }
  0x60   :  { %385 = vmatprep.mubr.bf16.mxu1 %v1910_v1  ;;  %1553 = vmatprep.mubr.msk.bf16.mxu0 %vm1911_vm0, %v1909_v0 }
  0x67   :  { %386 = vmatmul.mubr.bf16.gmra.mxu1 %v1731_v28 }
  0x68   :  { %1577 = vmatprep.mubr.msk.bf16.mxu1 %vm1911_vm0, %v1909_v0 }
 0x11f   :  { %v377_v33 = vpop.f32.mrf.mxu1  ;;  %v216_v37 = vpop.f32.mrf.mxu0 }
 0x120   :  { %v378_v40 = vadd.f32 %v377_v33, %v244_v34  ;;  %v217_v43 = vadd.f32 %v1428_v36, %v216_v37 }
 0x121   :  { %v379_v35 = vpop.f32.mrf.mxu1  ;;  %v1549_v39 = vpop.f32.mrf.mxu0 }
 0x122   :  { %v396_v50 = vmul.f32 0.17677669, %v217_v43  ;;  %v380_v3 = vadd.f32 %v379_v35, %v248_v49 }
 0x123   :  { %v381_v38 = vpop.f32.mrf.mxu1  ;;  %v219_v45 = vpop.f32.mrf.mxu0 }
 0x124   :  { %v382_v42 = vadd.f32 %v381_v38, %v244_v34  ;;  %v2019_v56 = vpack.c.bf16 %v396_v50, %v396_v50  ;;  %v220_v59 = vadd.f32 %v1428_v36, %v219_v45 }
 0x125   :  { %v383_v44 = vpop.f32.mrf.mxu1  ;;  %v1550_v48 = vpop.f32.mrf.mxu0 }
 0x126   :  { %v2014_v46 = vpack.c.bf16 %v382_v42, %v378_v40  ;;  %v397_v1 = vmul.f32 0.17677669, %v220_v59  ;;  %v384_v2 = vadd.f32 %v383_v44, %v248_v49 }
 0x127   :  { %v387_v47 = vpop.f32.mrf.mxu1 }
 0x128   :  { %v409_v51 = vsel %vm404_vm1, %v2014_v46, 0  ;;  %v388_v53 = vadd.f32 %v387_v47, %v244_v34  ;;  %v2032_v4 = vpack.c.bf16 %v397_v1, %v397_v1  ;;  %v2034_v5 = vpack.c.bf16 %v384_v2, %v380_v3 }
 0x129   :  { %v389_v52 = vpop.f32.mrf.mxu1  ;;  %1552 = vmatpush3.bf16.xpose.msra.mxu0 %v409_v51 }
 0x12a   :  { %v390_v54 = vadd.f32 %v389_v52, %v248_v49  ;;  %1557 = vmatprep.subr.bf16.mxu0 %v1909_v0 }
 0x12b   :  { %v391_v55 = vpop.f32.mrf.mxu1 }
 0x12c   :  { %v392_v57 = vadd.f32 %v391_v55, %v244_v34 }
 0x12d   :  { %v393_v58 = vpop.f32.mrf.mxu1 }
 0x12e   :  { %v2021_v60 = vpack.c.bf16 %v392_v57, %v388_v53  ;;  %v394_v61 = vadd.f32 %v393_v58, %v248_v49 }
 0x130   :  { %1554 = vmatmul.mubr.msk.bf16.vlgmr.msra.gmra.mxu0 %vm404_vm1, %v2019_v56  ;;  %v455_v62 = vsel %vm404_vm1, %v2021_v60, 0  ;;  %v2027_v63 = vpack.c.bf16 %v394_v61, %v390_v54 }
 0x131   :  { %1558 = vmatpush3.bf16.xpose.msra.mxu0 %v455_v62  ;;  %1559 = vmatprep.mubr.msk.bf16.mxu0 %vm1911_vm0, %v1909_v0 }
 0x132   :  { %1563 = vmatprep.subr.bf16.mxu0 %v1909_v0 }
 0x138   :  { %1560 = vmatmul.mubr.msk.bf16.vlgmr.msra.gmra.mxu0 %vm404_vm1, %v2032_v4 }
 0x139   :  { %1564 = vmatpush3.bf16.msra.mxu0 %v2034_v5  ;;  %1565 = vmatprep.mubr.msk.bf16.mxu0 %vm1911_vm0, %v1909_v0 }
 0x13a   :  { %1569 = vmatprep.subr.bf16.mxu0 %v1909_v0 }
 0x1f0   :  { %v445_v6 = vpop.f32.mrf.mxu0 }
 0x1f1   :  { %v498_v7 = vsel %vm497_vm2, %v445_v6, -inf }
 0x1f2   :  { %499 = vmax.xlane.f32.xlu0 %v498_v7  ;;  %v1555_v8 = vpop.f32.mrf.mxu0 }
 0x1f4   :  { %v448_v9 = vpop.f32.mrf.mxu0 }
 0x1f6   :  { %v1556_v10 = vpop.f32.mrf.mxu0 }
 0x1f8   :  { %v491_v11 = vpop.f32.mrf.mxu0 }
 0x1f9   :  { %v501_v12 = vsel %vm497_vm2, %v491_v11, -inf }
 0x1fa   :  { %502 = vmax.xlane.f32.xlu0 %v501_v12  ;;  %v1561_v13 = vpop.f32.mrf.mxu0 }
 0x1fc   :  { %v494_v14 = vpop.f32.mrf.mxu0 }
 0x1fe   :  { %v1562_v15 = vpop.f32.mrf.mxu0 }
 0x210   :  { %612 = vrot.lane.b32.xlu0 %v2014_v46, %s1912_s5 }
 0x27b   :  { %v500_v16 = vpop.xlane.xlu0 %499 }
 0x27c   :  { %v504_v17 = vsub.f32 %v445_v6, %v500_v16 }
 0x27e   :  { %v506_v18 = vmul.f32 1.442695, %v504_v17 }
 0x280   :  { %1740 = vpow2.f32 %v506_v18 }
 0x283   :  { %v503_v19 = vpop.xlane.xlu0 %502 }
 0x284   :  { %v505_v24 = vsub.f32 %v491_v11, %v503_v19 }
 0x286   :  { %v508_v25 = vmul.f32 1.442695, %v505_v24 }
 0x287   :  { %v613_v20 = vpop.permute.xlu0 %612 }
 0x288   :  { %v618_v21 = vsel %vm404_vm1, %v613_v20, 0  ;;  %1742 = vpow2.f32 %v508_v25 }
 0x289   :  { %1576 = vmatpush3.bf16.xpose.msra.mxu1 %v618_v21 }
 0x28a   :  { %1587 = vmatprep.subr.bf16.mxu1 %v1909_v0 }
 0x28d   :  { %v1741_v22 = vpop.eup %1740 }
 0x28e   :  { %v510_v23 = vsel %vm497_vm2, %v1741_v22, 0.0 }
 0x28f   :  { %511 = vadd.xlane.f32.xlu1 %v510_v23 }
 0x295   :  { %v1743_v26 = vpop.eup %1742 }
 0x296   :  { %v513_v27 = vsel %vm497_vm2, %v1743_v26, 0.0 }
 0x2a0   :  { %664 = vrot.lane.b32.xlu1 %v2021_v60, %s1912_s5 }
 0x2c4   :  { %514 = vadd.xlane.f32.xlu1 %v513_v27 }
 0x2d5   :  { %609 = vrot.lane.b32.xlu1 %v2019_v56, %s1912_s5 }
 0x2d9   :  { %661 = vrot.lane.b32.xlu1 %v2032_v4, %s1912_s5 }
 0x318   :  { %v512_v28 = vpop.xlane.xlu1 %511 }
 0x319   :  { %1744 = vrcp.f32 %v512_v28 }
 0x31c   :  { %v665_v32 = vpop.permute.xlu1 %664 }
 0x31d   :  { %v670_v38 = vsel %vm404_vm1, %v665_v32, 0 }
 0x326   :  { %v1745_v29 = vpop.eup %1744 }
 0x327   :  { %v518_v30 = vmul.f32 %v1745_v29, %v1741_v22 }
 0x329   :  { %v520_v31 = vpack.c.bf16 %v518_v30, %v518_v30 }
 0x32b   :  { %1566 = vmatmul.mubr.msk.bf16.vlgmr.msra.gmra.mxu0 %vm497_vm2, %v520_v31 }
 0x32c   :  { %1570 = vmatpush3.bf16.msra.mxu0 %v2027_v63  ;;  %1571 = vmatprep.mubr.msk.bf16.mxu0 %vm1911_vm0, %v1909_v0 }
 0x32d   :  { %1581 = vmatprep.subr.bf16.mxu0 %v1909_v0 }
 0x34d   :  { %v515_v33 = vpop.xlane.xlu1 %514 }
 0x34e   :  { %1746 = vrcp.f32 %v515_v33 }
 0x351   :  { %v610_v34 = vpop.permute.xlu1 %609 }
 0x352   :  { %1578 = vmatmul.mubr.msk.bf16.vlgmr.msra.gmra.mxu1 %vm404_vm1, %v610_v34 }
 0x353   :  { %1589 = vmatprep.mubr.msk.bf16.mxu1 %vm1911_vm0, %v1909_v0 }
 0x355   :  { %v662_v39 = vpop.permute.xlu1 %661 }
 0x35b   :  { %v1747_v35 = vpop.eup %1746 }
 0x35c   :  { %v519_v36 = vmul.f32 %v1747_v35, %v1743_v26 }
 0x35e   :  { %v521_v37 = vpack.c.bf16 %v519_v36, %v519_v36 }
 0x360   :  { %1572 = vmatmul.mubr.msk.bf16.vlgmr.msra.gmra.mxu0 %vm497_vm2, %v521_v37 }
 0x361   :  { %1582 = vmatpush3.bf16.xpose.msra.mxu0 %v670_v38  ;;  %1583 = vmatprep.mubr.msk.bf16.mxu0 %vm1911_vm0, %v1909_v0 }
 0x362   :  { %1593 = vmatprep.subr.bf16.mxu0 %v1909_v0 }
 0x368   :  { %1584 = vmatmul.mubr.msk.bf16.vlgmr.msra.gmra.mxu0 %vm404_vm1, %v662_v39 }
 0x369   :  { %1595 = vmatprep.mubr.msk.bf16.mxu0 %vm1911_vm0, %v1909_v0 }
 0x3eb   :  { %v2072_v40 = vpop.f32.mrf.mxu0 }
 0x3ed   :  { %v1567_v41 = vpop.f32.mrf.mxu0 }
 0x3ef   :  { %v562_v42 = vpop.f32.mrf.mxu0 }
 0x3f1   :  { %v1568_v43 = vpop.f32.mrf.mxu0 }
 0x412   :  { %v654_v44 = vpop.f32.mrf.mxu1 }
 0x413   :  { %v712_v45 = vsel %vm497_vm2, %v654_v44, -inf }
 0x414   :  { %713 = vmax.xlane.f32.xlu0 %v712_v45  ;;  %v1579_v47 = vpop.f32.mrf.mxu1 }
 0x416   :  { %v657_v48 = vpop.f32.mrf.mxu1 }
 0x418   :  { %v1580_v49 = vpop.f32.mrf.mxu1 }
 0x420   :  { %v2075_v50 = vpop.f32.mrf.mxu0 }
 0x422   :  { %v1573_v51 = vpop.f32.mrf.mxu0 }
 0x424   :  { %v605_v52 = vpop.f32.mrf.mxu0 }
 0x426   :  { %v1574_v53 = vpop.f32.mrf.mxu0 }
 0x428   :  { %v706_v54 = vpop.f32.mrf.mxu0 }
 0x429   :  { %v715_v55 = vsel %vm497_vm2, %v706_v54, -inf }
 0x42a   :  { %716 = vmax.xlane.f32.xlu1 %v715_v55  ;;  %v1585_v57 = vpop.f32.mrf.mxu0 }
 0x42c   :  { %v709_v58 = vpop.f32.mrf.mxu0 }
 0x42e   :  { %v1586_v59 = vpop.f32.mrf.mxu0 }
 0x43b   :  { %784 = vrot.lane.b32.xlu1 %v2027_v63, %s1912_s5 }
 0x43f   :  { %832 = vrot.lane.b32.xlu1 %v2014_v46, %s1902_s10 }
 0x443   :  { %882 = vrot.lane.b32.xlu1 %v2021_v60, %s1902_s10 }
 0x447   :  { %880 = vrot.lane.b32.xlu1 %v2032_v4, %s1902_s10 }
 0x49d   :  { %v714_v61 = vpop.xlane.xlu0 %713 }
 0x49e   :  { %v718_v62 = vsub.f32 %v654_v44, %v714_v61 }
 0x4a0   :  { %v720_v1 = vmul.f32 1.442695, %v718_v62 }
 0x4a2   :  { %1748 = vpow2.f32 %v720_v1 }
 0x4af   :  { %v1749_v2 = vpop.eup %1748 }
 0x4b0   :  { %v724_v3 = vsel %vm497_vm2, %v1749_v2, 0.0 }
 0x4b1   :  { %725 = vadd.xlane.f32.xlu0 %v724_v3 }
 0x4b3   :  { %v717_v6 = vpop.xlane.xlu1 %716 }
 0x4b4   :  { %v719_v7 = vsub.f32 %v706_v54, %v717_v6 }
 0x4b6   :  { %v722_v8 = vmul.f32 1.442695, %v719_v7 }
 0x4b7   :  { %v785_v9 = vpop.permute.xlu1 %784 }
 0x4b8   :  { %1750 = vpow2.f32 %v722_v8  ;;  %1594 = vmatpush3.bf16.msra.mxu0 %v785_v9 }
 0x4b9   :  { %1605 = vmatprep.subr.bf16.mxu0 %v1909_v0 }
 0x4bb   :  { %v833_v17 = vpop.permute.xlu1 %832 }
 0x4bc   :  { %v838_v19 = vsel %vm404_vm1, %v833_v17, 0 }
 0x4bf   :  { %v883_v23 = vpop.permute.xlu1 %882 }
 0x4c0   :  { %v888_v25 = vsel %vm404_vm1, %v883_v23, 0 }
 0x4c3   :  { %v881_v26 = vpop.permute.xlu1 %880 }
 0x4c5   :  { %v1751_v10 = vpop.eup %1750 }
 0x4c6   :  { %v727_v11 = vsel %vm497_vm2, %v1751_v10, 0.0 }
 0x4c7   :  { %728 = vadd.xlane.f32.xlu0 %v727_v11 }
 0x4dd   :  { %737 = vrot.lane.b32.xlu0 %v2034_v5, %s1912_s5 }
 0x4e1   :  { %830 = vrot.lane.b32.xlu0 %v2019_v56, %s1902_s10 }
 0x53a   :  { %v726_v12 = vpop.xlane.xlu0 %725 }
 0x53b   :  { %1752 = vrcp.f32 %v726_v12 }
 0x548   :  { %v1753_v13 = vpop.eup %1752 }
 0x549   :  { %v732_v15 = vmul.f32 %v1753_v13, %v1749_v2 }
 0x54b   :  { %v734_v18 = vpack.c.bf16 %v732_v15, %v732_v15 }
 0x550   :  { %v729_v14 = vpop.xlane.xlu0 %728 }
 0x551   :  { %1754 = vrcp.f32 %v729_v14 }
 0x554   :  { %v738_v16 = vpop.permute.xlu0 %737 }
 0x555   :  { %1588 = vmatpush3.bf16.msra.mxu1 %v738_v16 }
 0x556   :  { %1599 = vmatprep.subr.bf16.mxu1 %v1909_v0 }
 0x558   :  { %1590 = vmatmul.mubr.msk.bf16.vlgmr.msra.gmra.mxu1 %vm497_vm2, %v734_v18  ;;  %v831_v21 = vpop.permute.xlu0 %830 }
 0x559   :  { %1600 = vmatpush3.bf16.xpose.msra.mxu1 %v838_v19  ;;  %1601 = vmatprep.mubr.msk.bf16.mxu1 %vm1911_vm0, %v1909_v0 }
 0x55a   :  { %1611 = vmatprep.subr.bf16.mxu1 %v1909_v0 }
 0x55e   :  { %v1755_v20 = vpop.eup %1754 }
 0x55f   :  { %v733_v22 = vmul.f32 %v1755_v20, %v1751_v10 }
 0x560   :  { %1602 = vmatmul.mubr.msk.bf16.vlgmr.msra.gmra.mxu1 %vm404_vm1, %v831_v21 }
 0x561   :  { %v735_v24 = vpack.c.bf16 %v733_v22, %v733_v22  ;;  %1613 = vmatprep.mubr.msk.bf16.mxu1 %vm1911_vm0, %v1909_v0 }
 0x563   :  { %1596 = vmatmul.mubr.msk.bf16.vlgmr.msra.gmra.mxu0 %vm497_vm2, %v735_v24 }
 0x564   :  { %1606 = vmatpush3.bf16.xpose.msra.mxu0 %v888_v25  ;;  %1607 = vmatprep.mubr.msk.bf16.mxu0 %vm1911_vm0, %v1909_v0 }
 0x565   :  { %1617 = vmatprep.subr.bf16.mxu0 %v1909_v0 }
 0x56b   :  { %1608 = vmatmul.mubr.msk.bf16.vlgmr.msra.gmra.mxu0 %vm404_vm1, %v881_v26 }
 0x56c   :  { %1619 = vmatprep.mubr.msk.bf16.mxu0 %vm1911_vm0, %v1909_v0 }
 0x618   :  { %v2110_v27 = vpop.f32.mrf.mxu1 }
 0x61a   :  { %v1591_v28 = vpop.f32.mrf.mxu1 }
 0x61c   :  { %v780_v29 = vpop.f32.mrf.mxu1 }
 0x61e   :  { %v1592_v30 = vpop.f32.mrf.mxu1 }
 0x620   :  { %v874_v31 = vpop.f32.mrf.mxu1 }
 0x621   :  { %v930_v32 = vsel %vm497_vm2, %v874_v31, -inf }
 0x622   :  { %931 = vmax.xlane.f32.xlu0 %v930_v32  ;;  %v1603_v33 = vpop.f32.mrf.mxu1 }
 0x623   :  { %v2113_v34 = vpop.f32.mrf.mxu0 }
 0x624   :  { %v1682_v35 = vpack.i.bf16 %v2113_v34, %v2110_v27  ;;  %v877_v36 = vpop.f32.mrf.mxu1 }
 0x625   :  { %v1597_v37 = vpop.f32.mrf.mxu0 }
 0x626   :  { %v1604_v38 = vpop.f32.mrf.mxu1 }
 0x627   :  { %v827_v39 = vpop.f32.mrf.mxu0 }
 0x629   :  { %v1598_v41 = vpop.f32.mrf.mxu0 }
 0x62b   :  { %v924_v42 = vpop.f32.mrf.mxu0 }
 0x62c   :  { %v933_v43 = vsel %vm497_vm2, %v924_v42, -inf }
 0x62d   :  { %934 = vmax.xlane.f32.xlu1 %v933_v43  ;;  %v1609_v44 = vpop.f32.mrf.mxu0 }
 0x62f   :  { %v927_v45 = vpop.f32.mrf.mxu0 }
 0x631   :  { %v1610_v47 = vpop.f32.mrf.mxu0 }
 0x63e   :  { %1000 = vrot.lane.b32.xlu1 %v2027_v63, %s1902_s10 }
 0x642   :  { %1048 = vrot.lane.b32.xlu1 %v2014_v46, %s1913_s6 }
 0x646   :  { %1098 = vrot.lane.b32.xlu1 %v2021_v60, %s1913_s6 }
 0x64a   :  { %1096 = vrot.lane.b32.xlu1 %v2032_v4, %s1913_s6 }
 0x6ab   :  { %v932_v48 = vpop.xlane.xlu0 %931 }
 0x6ac   :  { %v936_v49 = vsub.f32 %v874_v31, %v932_v48 }
 0x6ae   :  { %v938_v51 = vmul.f32 1.442695, %v936_v49 }
 0x6b0   :  { %1756 = vpow2.f32 %v938_v51 }
 0x6b6   :  { %v935_v52 = vpop.xlane.xlu1 %934 }
 0x6b7   :  { %v937_v53 = vsub.f32 %v924_v42, %v935_v52 }
 0x6b9   :  { %v940_v54 = vmul.f32 1.442695, %v937_v53 }
 0x6ba   :  { %v1001_v55 = vpop.permute.xlu1 %1000 }
 0x6bb   :  { %1758 = vpow2.f32 %v940_v54  ;;  %1618 = vmatpush3.bf16.msra.mxu0 %v1001_v55  ;;  %v1733_v54 = vld [vmem:[#allocation10 + $0x30] sm:$0xff]   ;;  %v1734_v55 = vld [vmem:[#allocation10 + $0x28] sm:$0xff]  }
 0x6bc   :  { %1629 = vmatprep.subr.bf16.mxu0 %v1909_v0 }
 0x6bd   :  { %v1757_v57 = vpop.eup %1756 }
 0x6be   :  { %v942_v46 = vsel %vm497_vm2, %v1757_v57, 0.0  ;;  %v1049_v2 = vpop.permute.xlu1 %1048 }
 0x6bf   :  { %943 = vadd.xlane.f32.xlu0 %v942_v46  ;;  %v1054_v6 = vsel %vm404_vm1, %v1049_v2, 0  ;;  %v1736_v46 = vld [vmem:[#allocation10 + $0x18] sm:$0xff]  }
 0x6c2   :  { %v1099_v9 = vpop.permute.xlu1 %1098 }
 0x6c3   :  { %v1104_v11 = vsel %vm404_vm1, %v1099_v9, 0 }
 0x6c6   :  { %v1097_v12 = vpop.permute.xlu1 %1096 }
 0x6c8   :  { %v1759_v60 = vpop.eup %1758 }
 0x6c9   :  { %v945_v58 = vsel %vm497_vm2, %v1759_v60, 0.0 }
 0x6ca   :  { %946 = vadd.xlane.f32.xlu0 %v945_v58  ;;  %v1738_v58 = vld [vmem:[#allocation10 + $0x8] sm:$0xff]  }
 0x6e0   :  { %954 = vrot.lane.b32.xlu0 %v2034_v5, %s1902_s10 }
 0x6e4   :  { %1046 = vrot.lane.b32.xlu0 %v2019_v56, %s1913_s6 }
 0x748   :  { %v944_v4 = vpop.xlane.xlu0 %943 }
 0x749   :  { %1760 = vrcp.f32 %v944_v4 }
 0x753   :  { %v947_v59 = vpop.xlane.xlu0 %946 }
 0x754   :  { %1762 = vrcp.f32 %v947_v59 }
 0x756   :  { %v1761_v61 = vpop.eup %1760 }
 0x757   :  { %v955_v62 = vpop.permute.xlu0 %954  ;;  %v950_v1 = vmul.f32 %v1761_v61, %v1757_v57  ;;  %v1735_v57 = vld [vmem:[#allocation10 + $0x20] sm:$0xff]  }
 0x758   :  { %1612 = vmatpush3.bf16.msra.mxu1 %v955_v62  ;;  %v1739_v61 = vld [vmem:[#allocation10] sm:$0xff]  }
 0x759   :  { %v952_v3 = vpack.c.bf16 %v950_v1, %v950_v1  ;;  %1623 = vmatprep.subr.bf16.mxu1 %v1909_v0 }
 0x75b   :  { %1614 = vmatmul.mubr.msk.bf16.vlgmr.msra.gmra.mxu1 %vm497_vm2, %v952_v3  ;;  %v1047_v7 = vpop.permute.xlu0 %1046 }
 0x75c   :  { %1624 = vmatpush3.bf16.xpose.msra.mxu1 %v1054_v6  ;;  %1625 = vmatprep.mubr.msk.bf16.mxu1 %vm1911_vm0, %v1909_v0 }
 0x75d   :  { %1635 = vmatprep.subr.bf16.mxu1 %v1909_v0 }
 0x761   :  { %v1763_v56 = vpop.eup %1762 }
 0x762   :  { %v951_v8 = vmul.f32 %v1763_v56, %v1759_v60  ;;  %v1737_v60 = vld [vmem:[#allocation10 + $0x10] sm:$0xff]  }
 0x763   :  { %1626 = vmatmul.mubr.msk.bf16.vlgmr.msra.gmra.mxu1 %vm404_vm1, %v1047_v7 }
 0x764   :  { %v953_v10 = vpack.c.bf16 %v951_v8, %v951_v8  ;;  %1637 = vmatprep.mubr.msk.bf16.mxu1 %vm1911_vm0, %v1909_v0 }
 0x766   :  { %1620 = vmatmul.mubr.msk.bf16.vlgmr.msra.gmra.mxu0 %vm497_vm2, %v953_v10 }
 0x767   :  { %1630 = vmatpush3.bf16.xpose.msra.mxu0 %v1104_v11  ;;  %1631 = vmatprep.mubr.msk.bf16.mxu0 %vm1911_vm0, %v1909_v0 }
 0x768   :  { %1641 = vmatprep.subr.bf16.mxu0 %v1909_v0 }
 0x76e   :  { %1632 = vmatmul.mubr.msk.bf16.vlgmr.msra.gmra.mxu0 %vm404_vm1, %v1097_v12 }
 0x76f   :  { %1643 = vmatprep.mubr.msk.bf16.mxu0 %vm1911_vm0, %v1909_v0 }
 0x81b   :  { %v994_v13 = vpop.f32.mrf.mxu1 }
 0x81d   :  { %v1615_v14 = vpop.f32.mrf.mxu1 }
 0x81f   :  { %v997_v15 = vpop.f32.mrf.mxu1 }
 0x821   :  { %v1616_v16 = vpop.f32.mrf.mxu1 }
 0x823   :  { %v1090_v17 = vpop.f32.mrf.mxu1 }
 0x824   :  { %v1146_v18 = vsel %vm497_vm2, %v1090_v17, -inf }
 0x825   :  { %1147 = vmax.xlane.f32.xlu0 %v1146_v18  ;;  %v1627_v19 = vpop.f32.mrf.mxu1 }
 0x826   :  { %v1040_v20 = vpop.f32.mrf.mxu0 }
 0x827   :  { %v1093_v21 = vpop.f32.mrf.mxu1  ;;  %v1687_v32 = vpack.i.bf16 %v1040_v20, %v994_v13 }
 0x828   :  { %v1621_v22 = vpop.f32.mrf.mxu0 }
 0x829   :  { %v1628_v23 = vpop.f32.mrf.mxu1 }
 0x82a   :  { %v1043_v24 = vpop.f32.mrf.mxu0  ;;  %v1472_v23 = vld [vmem:[%s2196_s7] ss:$0 sm:$0xff] }
 0x82c   :  { %v1622_v25 = vpop.f32.mrf.mxu0 }
 0x82e   :  { %v1140_v26 = vpop.f32.mrf.mxu0 }
 0x82f   :  { %v1149_v28 = vsel %vm497_vm2, %v1140_v26, -inf }
 0x830   :  { %1150 = vmax.xlane.f32.xlu1 %v1149_v28  ;;  %v1633_v29 = vpop.f32.mrf.mxu0 }
 0x832   :  { %v1143_v30 = vpop.f32.mrf.mxu0 }
 0x834   :  { %v1634_v31 = vpop.f32.mrf.mxu0 }
 0x841   :  { %1216 = vrot.lane.b32.xlu1 %v2027_v63, %s1913_s6 }
 0x845   :  { %1683 = vrot.lane.b32.xlu1 %v1682_v35, %s1913_s6 }
 0x849   :  { %1688 = vrot.lane.b32.xlu1 %v1687_v32, %s1902_s10 }
 0x8ae   :  { %v1148_v33 = vpop.xlane.xlu0 %1147 }
 0x8af   :  { %v1152_v36 = vsub.f32 %v1090_v17, %v1148_v33 }
 0x8b1   :  { %v1154_v37 = vmul.f32 1.442695, %v1152_v36 }
 0x8b3   :  { %1764 = vpow2.f32 %v1154_v37 }
 0x8b9   :  { %v1151_v38 = vpop.xlane.xlu1 %1150 }
 0x8ba   :  { %v1153_v39 = vsub.f32 %v1140_v26, %v1151_v38 }
 0x8bc   :  { %v1156_v41 = vmul.f32 1.442695, %v1153_v39 }
 0x8bd   :  { %v1217_v42 = vpop.permute.xlu1 %1216 }
 0x8be   :  { %1766 = vpow2.f32 %v1156_v41  ;;  %1642 = vmatpush3.bf16.msra.mxu0 %v1217_v42 }
 0x8c0   :  { %v1765_v43 = vpop.eup %1764 }
 0x8c1   :  { %v1158_v63 = vsel %vm497_vm2, %v1765_v43, 0.0  ;;  %v1684_v8 = vpop.permute.xlu1 %1683 }
 0x8c2   :  { %1159 = vadd.xlane.f32.xlu0 %v1158_v63  ;;  %v1686_v10 = vunpack.i.h.bf16 %v1684_v8  ;;  %v1685_v11 = vunpack.i.l.bf16 %v1684_v8 }
 0x8c4   :  { %v1287_v14 = vsel %vm404_vm1, %v2075_v50, %v1686_v10  ;;  %v1286_v15 = vsel %vm404_vm1, %v2072_v40, %v1685_v11 }
 0x8c5   :  { %v1689_v9 = vpop.permute.xlu1 %1688 }
 0x8c6   :  { %v1691_v12 = vunpack.i.h.bf16 %v1689_v9  ;;  %v1690_v13 = vunpack.i.l.bf16 %v1689_v9 }
 0x8c8   :  { %v1289_v18 = vsel %vm1288_vm3, %v1286_v15, %v1690_v13  ;;  %v1290_v19 = vsel %vm1288_vm3, %v1287_v14, %v1691_v12 }
 0x8cb   :  { %v1767_v44 = vpop.eup %1766 }
 0x8cc   :  { %v1161_v27 = vsel %vm497_vm2, %v1767_v44, 0.0 }
 0x8cd   :  { %1162 = vadd.xlane.f32.xlu0 %v1161_v27 }
 0x8e3   :  { %1170 = vrot.lane.b32.xlu0 %v2034_v5, %s1913_s6  ;;  %v1732_v5 = vld [vmem:[#allocation10 + $0x38] sm:$0xff]  }
 0x94b   :  { %v1160_v34 = vpop.xlane.xlu0 %1159 }
 0x94c   :  { %1768 = vrcp.f32 %v1160_v34 }
 0x956   :  { %v1163_v35 = vpop.xlane.xlu0 %1162 }
 0x957   :  { %1770 = vrcp.f32 %v1163_v35 }
 0x959   :  { %v1769_v45 = vpop.eup %1768 }
 0x95a   :  { %v1171_v47 = vpop.permute.xlu0 %1170  ;;  %v1166_v48 = vmul.f32 %v1769_v45, %v1765_v43 }
 0x95b   :  { %1636 = vmatpush3.bf16.msra.mxu1 %v1171_v47 }
 0x95c   :  { %v1168_v49 = vpack.c.bf16 %v1166_v48, %v1166_v48  ;;  %1647 = vmatprep.subr.bf16.mxu1 %v1909_v0 }
 0x95e   :  { %1638 = vmatmul.mubr.msk.bf16.vlgmr.msra.gmra.mxu1 %vm497_vm2, %v1168_v49 }
 0x95f   :  { %1663 = vmatprep.mubr.msk.bf16.mxu1 %vm1911_vm0, %v1909_v0  ;;  %1648 = vmatpush3.bf16.msra.mxu1 %v1732_v5 }
 0x960   :  { %1649 = vmatprep.subr.bf16.mxu1 %v1909_v0 }
 0x963   :  { %1650 = vmatpush3.bf16.msra.mxu1 %v1733_v54 }
 0x964   :  { %v1771_v51 = vpop.eup %1770  ;;  %1651 = vmatprep.subr.bf16.mxu1 %v1909_v0 }
 0x965   :  { %v1167_v52 = vmul.f32 %v1771_v51, %v1767_v44 }
 0x967   :  { %v1169_v53 = vpack.c.bf16 %v1167_v52, %v1167_v52  ;;  %1652 = vmatpush3.bf16.msra.mxu1 %v1734_v55 }
 0x968   :  { %1653 = vmatprep.subr.bf16.mxu1 %v1909_v0 }
 0x969   :  { %1644 = vmatmul.mubr.msk.bf16.vlgmr.msra.gmra.mxu0 %vm497_vm2, %v1169_v53 }
 0x96b   :  { %1654 = vmatpush3.bf16.msra.mxu1 %v1735_v57 }
 0x96c   :  { %1655 = vmatprep.subr.bf16.mxu1 %v1909_v0 }
 0x96f   :  { %1656 = vmatpush3.bf16.msra.mxu1 %v1736_v46 }
 0x970   :  { %1657 = vmatprep.subr.bf16.mxu1 %v1909_v0 }
 0x973   :  { %1658 = vmatpush3.bf16.msra.mxu1 %v1737_v60 }
 0x974   :  { %1659 = vmatprep.subr.bf16.mxu1 %v1909_v0 }
 0x977   :  { %1660 = vmatpush3.bf16.msra.mxu1 %v1738_v58 }
 0x978   :  { %1661 = vmatprep.subr.bf16.mxu1 %v1909_v0 }
 0x97b   :  { %1662 = vmatpush3.bf16.msra.mxu1 %v1739_v61 }
 0xa1e   :  { %v1210_v4 = vpop.f32.mrf.mxu1 }
 0xa20   :  { %v1639_v59 = vpop.f32.mrf.mxu1 }
 0xa22   :  { %v1213_v62 = vpop.f32.mrf.mxu1 }
 0xa24   :  { %v1640_v1 = vpop.f32.mrf.mxu1 }
 0xa29   :  { %v1256_v2 = vpop.f32.mrf.mxu0 }
 0xa2a   :  { %v1692_v3 = vpack.i.bf16 %v1256_v2, %v1210_v4 }
 0xa2b   :  { %v1645_v6 = vpop.f32.mrf.mxu0 }
 0xa2c   :  { %1693 = vrot.lane.b32.xlu0 %v1692_v3, %s1912_s5 }
 0xa2d   :  { %v1259_v56 = vpop.f32.mrf.mxu0 }
 0xa2f   :  { %v1646_v7 = vpop.f32.mrf.mxu0 }
 0xa9e   :  { %v1694_v0 = vpop.permute.xlu0 %1693 }
 0xa9f   :  { %v1696_v16 = vunpack.i.h.bf16 %v1694_v0  ;;  %v1695_v17 = vunpack.i.l.bf16 %v1694_v0 }
 0xaa1   :  { %v1293_v20 = vsel %vm1291_vm4, %v1290_v19, %v1696_v16  ;;  %v1292_v21 = vsel %vm1291_vm4, %v1289_v18, %v1695_v17 }
 0xaa2   :  { %v1294_v22 = vpack.c.bf16 %v1293_v20, %v1292_v21 }
 0xaa4   :  { %1664 = vmatmul.mubr.bf16.vlgmr.msra.gmra.mxu1 %v1294_v22 }
 0xb64   :  { %v1400_v24 = vpop.f32.mrf.mxu1 }
 0xb65   :  { %v1401_v25 = vadd.f32 %v1472_v23, %v1400_v24 }
 0xb66   :  { %v1665_v26 = vpop.f32.mrf.mxu1 }
 0xb67   :  { %1407 = vst [vmem:[#allocation11] sm:$0xff] %v1401_v25 }
 0xb68   :  { %v1403_v50 = vpop.f32.mrf.mxu1 }
 0xb69   :  { %v1404_v40 = vadd.f32 %v1472_v23, %v1403_v50 }
 0xb6a   :  { %v1666_v28 = vpop.f32.mrf.mxu1 }
 0xb6b   :  { %1408 = vst [vmem:[#allocation11 + $0x8] sm:$0xff] %v1404_v40 }
 0xb6c   :  { %1883 = shalt.err (!%p1880_p1)
}
 0xb6d   :  { %1420 = dma.vmem_to_hbm [thread:$0]  %s1415_s14, 256, %s2197_s8, [#allocation4], %s1904_s15, %s1904_s15, %s1905_s16  }
 0xb6e   :  { %1898 = dma.done.wait [#allocation4], 256  }
 0xb6f   :  { %1899 = vsyncadd [#allocation4], 4294967040 }
 0xb70   :  { %1424 = vsyncpa [#allocation3], 1 }
 0xb71   :  { %1425 = vsyncpa [#allocation6], 1 }
 0xb72   :  { %1426 = vsyncpa [#allocation9], 1 }
 0xb73   :  { %1427 = vsyncpa [#allocation4], 1 }

</bundles_post_ra>
